<compile_context>
chip_gen: v7x
topology: tpu7x:2x2x1
jax: 0.10.0
libtpu: 0.0.40
codegen_flags: <defaults>
</compile_context>

<pallas_src>
import math

import jax
import jax.numpy as jnp
from jax.experimental import pallas as pl
from jax.experimental.pallas import tpu as pltpu

LANE = 128


def _round_up(x, m):
    return (x + m - 1) // m * m


def _vmem_block_bytes(rows, cols, itemsize, pack):
    # VMEM footprint of one buffered block (sublane/lane padded).
    return _round_up(max(rows, 1), pack) * _round_up(max(cols, 1), LANE) * itemsize


def _droppath_kernel(s_ref, x_ref, o_ref):
    # s_ref: (r, 1) float32 per-row keep/drop scale (VMEM sublane broadcast).
    # x_ref / o_ref: (r, c) tile of the flattened input.
    x = x_ref[...]
    s = s_ref[...].astype(x.dtype)          # native-dtype multiply (bf16 on v6e/v7x)
    o_ref[...] = (x * s).astype(o_ref.dtype)


def drop_path(x, *, drop_prob, key, training,
              block_bytes=8 * 1024 * 1024, donate_input=False):
    """DropPath forward matching the PyTorch module semantics.

    x: (B, ...) array; the keep/drop decision is per sample (leading axis).
    """
    if drop_prob == 0.0 or not training:
        return x
    keep_prob = 1.0 - drop_prob
    if keep_prob <= 0.0:
        # Every path dropped; the PyTorch reference would emit inf/nan via
        # div-by-zero, so return zeros instead.
        return jnp.zeros_like(x)

    B = x.shape[0]
    F = math.prod(x.shape[1:])
    itemsize = jnp.dtype(x.dtype).itemsize
    pack = max(8, 32 // itemsize)            # sublane packing: 8 f32 / 16 bf16 / 32 int8

    # Per-sample keep mask & scale in float32, so floor(keep_prob + u) never
    # rounds across the keep/drop boundary for low-precision inputs.
    u = jax.random.uniform(key, (B,), dtype=jnp.float32)
    scale = jnp.floor(keep_prob + u) * (1.0 / keep_prob)     # (B,) f32: 0 or 1/kp

    x2 = x.reshape(B, F)                     # free metadata reshape (row-major)
    budget = 4 * block_bytes                 # total for 2x in + 2x out buffers

    if F % LANE == 0:
        # ---- merged-rows path: (B*R, cols), rows tiled across samples ----
        cols = LANE
        while cols < 1024 and F % (2 * cols) == 0:
            cols *= 2                        # wider lanes -> cheaper per-row scale
        R = F // cols
        rows = B * R
        xv = x2.reshape(rows, cols)          # free metadata reshape
        sv = jnp.repeat(scale, R)[:, None]   # (rows, 1) f32 per-row scale (tiny)

        # Per-row VMEM cost: x in + x out (double-buffered) + the scale column,
        # which lane-pads 1 -> 128 in VMEM (hence the 2*LANE*4 term).
        per_row = 4 * cols * itemsize + 2 * LANE * 4
        rows_tile = max(pack, (budget // per_row) // pack * pack)
        rows_tile = min(rows, rows_tile)
        grid = (pl.cdiv(rows, rows_tile),)
        br, bc = rows_tile, cols
        x_spec = pl.BlockSpec((br, bc), lambda i: (i, 0))
        s_spec = pl.BlockSpec((br, 1), lambda i: (i, 0))
        semantics = ("parallel",)
    else:
        # ---- unaligned F: 2-D (B, F), ragged final block masked by Pallas ----
        xv = x2
        sv = scale[:, None]                  # (B, 1) f32 per-sample scale
        bs = B if B <= pack else pack
        bs_pad = _round_up(bs, pack)
        tile_f = max(LANE, (budget // (4 * bs_pad * itemsize)) // LANE * LANE)
        if tile_f >= F:
            tile_f = F                       # full dim: allowed even if unaligned
            if B > bs:                       # grow batch-per-block to fill budget
                per_sample = 4 * _round_up(F, LANE) * itemsize
                bs = min(B, max(pack, (budget // per_sample) // pack * pack))
        grid = (pl.cdiv(B, bs), pl.cdiv(F, tile_f))
        br, bc = bs, tile_f
        x_spec = pl.BlockSpec((br, bc), lambda i, j: (i, j))
        s_spec = pl.BlockSpec((br, 1), lambda i, j: (i, 0))
        semantics = ("parallel", "parallel")

    used = (4 * _vmem_block_bytes(br, bc, itemsize, pack)
            + 2 * _vmem_block_bytes(br, 1, 4, 8))
    # Above v5e's 16 MiB scoped default, below v7x's 64 MiB physical VMEM.
    vmem_limit = int(min(48 * 1024 * 1024,
                         max(32 * 1024 * 1024, used + 4 * 1024 * 1024)))

    out = pl.pallas_call(
        _droppath_kernel,
        out_shape=jax.ShapeDtypeStruct(xv.shape, x.dtype),
        grid_spec=pltpu.PrefetchScalarGridSpec(
            num_scalar_prefetch=0,
            grid=grid,
            in_specs=[s_spec, x_spec],
            out_specs=x_spec,
        ),
        compiler_params=pltpu.CompilerParams(
            dimension_semantics=semantics,
            vmem_limit_bytes=vmem_limit),
        input_output_aliases=({1: 0} if donate_input else {}),
    )(sv, xv)

    return out.reshape(x.shape)


if __name__ == "__main__":
    root = jax.random.PRNGKey(0)
    kx, kmask, kx2, kmask2 = jax.random.split(root, 4)

    # Small NCHW input consistent with the module's usage.
    B, C, H, W = 2, 4, 16, 16
    x = jax.random.normal(kx, (B, C, H, W), dtype=jnp.float32)
    drop_prob = 0.25
    keep_prob = 1.0 - drop_prob

    # Training-mode path (128-aligned features -> merged-rows path).
    out = drop_path(x, drop_prob=drop_prob, key=kmask, training=True)
    out = jax.block_until_ready(out)
    u = jax.random.uniform(kmask, (B,), dtype=jnp.float32)
    mask = jnp.floor(keep_prob + u).reshape(B, 1, 1, 1)
    ref = x / keep_prob * mask
    assert jnp.allclose(out, ref, rtol=1e-6, atol=1e-6), "mismatch vs reference (aligned)"

    # Non-128-aligned feature size exercises the 2-D ragged path (no padding).
    x_odd = jax.random.normal(kx2, (4, 3, 5, 7), dtype=jnp.float32)
    out_odd = jax.block_until_ready(
        drop_path(x_odd, drop_prob=0.4, key=kmask2, training=True))
    u2 = jax.random.uniform(kmask2, (4,), dtype=jnp.float32)
    mask2 = jnp.floor(0.6 + u2).reshape(4, 1, 1, 1)
    ref_odd = x_odd / 0.6 * mask2
    assert jnp.allclose(out_odd, ref_odd, rtol=1e-6, atol=1e-6), "mismatch (unaligned)"

    # Multi-step grid with a ragged last block (small block budget forces tiling).
    x_big = jax.random.normal(kx, (8, 64, 32, 32), dtype=jnp.float32)
    out_big = jax.block_until_ready(
        drop_path(x_big, drop_prob=drop_prob, key=kmask, training=True,
                  block_bytes=128 * 1024))
    u3 = jax.random.uniform(kmask, (8,), dtype=jnp.float32)
    mask3 = jnp.floor(keep_prob + u3).reshape(8, 1, 1, 1)
    ref_big = x_big / keep_prob * mask3
    assert jnp.allclose(out_big, ref_big, rtol=1e-6, atol=1e-6), "mismatch (tiled)"

    # bf16 input -> native bf16 multiply inside the kernel.
    x_bf = x.astype(jnp.bfloat16)
    out_bf = jax.block_until_ready(
        drop_path(x_bf, drop_prob=drop_prob, key=kmask, training=True))
    ref_bf = (x_bf.astype(jnp.float32) / keep_prob * mask)
    assert jnp.allclose(out_bf.astype(jnp.float32), ref_bf, rtol=2e-2, atol=2e-2), \
        "mismatch (bf16)"

    # Identity / all-dropped paths.
    assert jnp.array_equal(
        drop_path(x, drop_prob=drop_prob, key=kmask, training=False), x)
    assert jnp.array_equal(
        drop_path(x, drop_prob=0.0, key=kmask, training=True), x)
    assert jnp.array_equal(
        drop_path(x, drop_prob=1.0, key=kmask, training=True), jnp.zeros_like(x))

    print("KERNEL_OK")
</pallas_src>

<mosaic_0001>
module attributes {stable_mosaic.version = 11 : i64} {
  func.func @_droppath_kernel(%arg0: i32, %arg1: memref<2x1xf32, #tpu.memory_space<vmem>>, %arg2: memref<2x1024xf32, #tpu.memory_space<vmem>>, %arg3: memref<2x1024xf32, #tpu.memory_space<vmem>>) attributes {dimension_semantics = [#tpu.dimension_semantics<parallel>], iteration_bounds = array<i64: 1>, scalar_prefetch = 0 : i64, scratch_operands = 0 : i64, tpu.core_type = #tpu.core_type<tc>, window_params = [{transform_indices = @transform_0, window_bounds = array<i64: 2, 1>}, {transform_indices = @transform_1, window_bounds = array<i64: 2, 1024>}, {transform_indices = @transform_2, window_bounds = array<i64: 2, 1024>}]} {
    %c0 = arith.constant 0 : index
    %c0_0 = arith.constant 0 : index
    %0 = vector.load %arg2[%c0, %c0_0] : memref<2x1024xf32, #tpu.memory_space<vmem>>, vector<2x1024xf32>
    %c0_1 = arith.constant 0 : index
    %c0_2 = arith.constant 0 : index
    %1 = vector.load %arg1[%c0_1, %c0_2] : memref<2x1xf32, #tpu.memory_space<vmem>>, vector<2x1xf32>
    %2 = vector.broadcast %1 : vector<2x1xf32> to vector<2x1024xf32>
    %3 = arith.mulf %0, %2 : vector<2x1024xf32>
    %c0_3 = arith.constant 0 : index
    %c0_4 = arith.constant 0 : index
    %4 = vector.load %arg3[%c0_3, %c0_4] : memref<2x1024xf32, #tpu.memory_space<vmem>>, vector<2x1024xf32>
    tpu.vector_store %arg3[%c0_3, %c0_4], %3 {strides = array<i32>} : memref<2x1024xf32, #tpu.memory_space<vmem>>, vector<2x1024xf32>,
    return
  }
  func.func @transform_0(%arg0: i32) -> (i32, i32) {
    %c0_i32 = arith.constant 0 : i32
    %c0_i32_0 = arith.constant 0 : i32
    return %arg0, %c0_i32 : i32, i32
  }
  func.func @transform_1(%arg0: i32) -> (i32, i32) {
    %c0_i32 = arith.constant 0 : i32
    %c0_i32_0 = arith.constant 0 : i32
    return %arg0, %c0_i32 : i32, i32
  }
  func.func @transform_2(%arg0: i32) -> (i32, i32) {
    %c0_i32 = arith.constant 0 : i32
    %c0_i32_0 = arith.constant 0 : i32
    return %arg0, %c0_i32 : i32, i32
  }
}

</mosaic_0001>

<bundles_post_ra>
// kernel: tpu_custom_call.1
= control target key start
LH: loop header
LB: loop body
LE: loop exit
PB: predicated region body
PF: predicated region fallthrough
CT: control target
= control target key end

     0   :  { %7 = vsyncpa [#allocation3], 0  ;;  %s157_s0 = inlined_call_operand.vmem [shape: f32[2,1], index: 0, kind: input, shape index: {}]   ;;  %s158_s1 = inlined_call_operand.hbm [shape: f32[2,1024], index: 1, kind: input, shape index: {}]   ;;  %s159_s2 = inlined_call_operand.hbm [shape: f32[2,1024], index: 2, kind: output, shape index: {}]  }
   0x1   :  { %8 = vsyncpa [#allocation4], 0  ;;  %s111_s9 = smov [#allocation2]   ;;  %s63_s13 = scalar_lea.hbm %s158_s1, 256 }
   0x2   :  { %s17_s10 = sshll.u32 %s111_s9, 4  ;;  %p64_p0 = scmp.ne.s32.totalorder %s158_s1, %s63_s13  ;;  %s18_s10 = int_to_ptr.vmem [resolvable:$true] %s17_s10 }
   0x3   :  { %p67_p1 = scmp.lt.u32.totalorder %s63_s13, %s158_s1 }
   0x5   :  { %p69_p2 = pnand %p67_p1, %p64_p0 }
   0x7   :  { %72 = shalt.err (!%p69_p2)
}
   0x8   :  { %s73_s18 = scalar_lea.vmem %s18_s10, 256  ;;  %p78_p4 = scmp.lt.s32.totalorder %s18_s10, %s18_s10 }
   0x9   :  { %p74_p3 = scmp.ne.s32.totalorder %s18_s10, %s73_s18  ;;  %p79_p5 = scmp.lt.s32.totalorder %s73_s18, %s73_s18 }
   0xb   :  { %p80_p6 = por %p79_p5, %p78_p4 }
   0xd   :  { %p81_p7 = pnand %p80_p6, %p74_p3 }
   0xf   :  { %84 = shalt.err (!%p81_p7)
}
  0x10   :  { %20 = dma.hbm_to_vmem [thread:$0]  %s158_s1, 256, %s18_s10, [#allocation3]  }
  0x11   :  { %107 = dma.done.wait [#allocation3], 256  }
  0x12   :  { %108 = vsyncadd [#allocation3], 4294967040  ;;  %v112_v0 = vmov 0   ;;  %v26_v1 = vld [vmem:[%s157_s0] sm:$0x3]  ;;  %v34_v4 = vlaneseq  ;;  %v25_v10 = vld [vmem:[#allocation2 + $0x8] sm:$0xff] }
  0x13   :  { %62 = vset.pattern.permute.xlu0 %v112_v0  ;;  %v113_v2 = vmov 269488144   ;;  %v24_v9 = vld [vmem:[#allocation2] sm:$0xff]  ;;  %s114_s23 = smov [#allocation5]  }
  0x14   :  { %29 = vperm.xlu0 %62, %v26_v1   ;;  %v32_v3 = vunpack.c.l.s4 %v113_v2  ;;  %v35_v6 = vshrl.u32 %v34_v4, 7  ;;  %s49_s1 = sshll.u32 %s114_s23, 4  ;;  %s50_s1 = int_to_ptr.vmem [resolvable:$true] %s49_s1 }
  0x15   :  { %s85_s24 = scalar_lea.vmem %s50_s1, 256  ;;  %p90_p9 = scmp.lt.s32.totalorder %s50_s1, %s50_s1 }
  0x16   :  { %v33_v5 = vunpack.c.0.s8 %v32_v3  ;;  %p86_p8 = scmp.ne.s32.totalorder %s50_s1, %s85_s24  ;;  %p91_p10 = scmp.lt.s32.totalorder %s85_s24, %s85_s24 }
  0x18   :  { %v36_v7 = vsub.s32 %v33_v5, %v35_v6  ;;  %p92_p11 = por %p91_p10, %p90_p9 }
  0x1a   :  { %p93_p12 = pnand %p92_p11, %p86_p8 }
  0x93   :  { %v30_v8 = vpop.permute.xlu0 %29 }
  0x94   :  { %v37_v11 = vrot.slane %v30_v8, %v36_v7 }
  0x96   :  { %v39_v12 = vmul.f32 %v37_v11, %v24_v9  ;;  %v40_v13 = vmul.f32 %v37_v11, %v25_v10 }
  0x98   :  { %41 = vst [vmem:[#allocation5] sm:$0xff] %v39_v12  ;;  %42 = vst [vmem:[#allocation5 + $0x8] sm:$0xff] %v40_v13 }
  0x99   :  { %96 = shalt.err (!%p93_p12)
}
  0x9a   :  { %s97_s26 = scalar_lea.hbm %s159_s2, 256 }
  0x9b   :  { %p98_p13 = scmp.ne.s32.totalorder %s159_s2, %s97_s26  ;;  %p101_p0 = scmp.lt.u32.totalorder %s97_s26, %s159_s2 }
  0x9d   :  { %p103_p1 = pnand %p101_p0, %p98_p13 }
  0x9f   :  { %106 = shalt.err (!%p103_p1)
}
  0xa0   :  { %52 = dma.vmem_to_hbm [thread:$0]  %s50_s1, 256, %s159_s2, [#allocation4]  }
  0xa1   :  { %109 = dma.done.wait [#allocation4], 256  }
  0xa2   :  { %110 = vsyncadd [#allocation4], 4294967040 }
  0xa3   :  { %56 = vsyncpa [#allocation3], 1 }
  0xa4   :  { %57 = vsyncpa [#allocation4], 1 }

</bundles_post_ra>
